<compile_context>
chip_gen: v7x
topology: tpu7x:2x2x1
jax: 0.10.0
libtpu: 0.0.40
codegen_flags: <defaults>
</compile_context>

<pallas_src>
import functools

import jax
import jax.numpy as jnp
from jax.experimental import pallas as pl
from jax.experimental.pallas import tpu as pltpu


def munet_kernel(x_ref, w1_ref, b1_ref, w2_ref, b2_ref, w3_ref, b3_ref, o_ref):
    xt = x_ref[...]                                        # [3, TB] bf16
    # fc1: [128, 3] @ [3, TB] -> [128, TB], f32 accumulate, ReLU.
    h1 = jnp.dot(w1_ref[...], xt,
                 preferred_element_type=jnp.float32) + b1_ref[...]
    h1 = jnp.maximum(h1, 0.0)
    # fc2: [64, 128] @ [128, TB] -> [64, TB], f32 accumulate, ReLU.
    h2 = jnp.dot(w2_ref[...], h1.astype(jnp.bfloat16),
                 preferred_element_type=jnp.float32) + b2_ref[...]
    h2 = jnp.maximum(h2, 0.0)
    # fc_mu (64 -> 1): VPU multiply + reduce over the feature (sublane) axis.
    mu = jnp.sum(h2 * w3_ref[...], axis=0, keepdims=True) + b3_ref[...]  # [1, TB]
    o_ref[...] = jnp.tanh(mu) * 2.0


def _round_up(n: int, m: int) -> int:
    return ((n + m - 1) // m) * m


@functools.partial(jax.jit, static_argnames=("tb",))
def munet_forward(x, params, tb=2048):
    """x: [B, 3] float32 -> mu: [B, 1] float32 (matches PyTorch MuNet.forward)."""
    w1, b1, w2, b2, w3, b3 = params          # PyTorch layout: W (out, in), b (out,)
    B = x.shape[0]

    # Batch tile: lane axis must be a multiple of 128; cap at `tb`.
    tb_eff = min(tb, _round_up(B, 128))
    bp = _round_up(B, tb_eff)

    # Layout plumbing (wrapper-side, outside the kernel).
    xt = jnp.pad(x.T.astype(jnp.bfloat16), ((0, 0), (0, bp - B)))     # [3, Bp]
    w1b = w1.astype(jnp.bfloat16)                                     # [128, 3]
    w2b = w2.astype(jnp.bfloat16)                                     # [64, 128]
    b1c = b1.astype(jnp.float32).reshape(-1, 1)                       # [128, 1]
    b2c = b2.astype(jnp.float32).reshape(-1, 1)                       # [64, 1]
    w3c = w3.astype(jnp.float32).reshape(-1, 1)                       # [64, 1]
    b3c = b3.astype(jnp.float32).reshape(1, 1)                        # [1, 1]

    def const(a):
        return pl.BlockSpec(a.shape, lambda i: (0,) * a.ndim,
                            memory_space=pltpu.VMEM)

    cost = pl.CostEstimate(
        flops=2 * bp * (3 * 128 + 128 * 64 + 64),
        transcendentals=bp,
        bytes_accessed=bp * (3 * 2 + 1 * 4)
        + (128 * 3 + 64 * 128) * 2 + (128 + 64 + 64 + 1) * 4,
    )

    out_t = pl.pallas_call(
        munet_kernel,
        out_shape=jax.ShapeDtypeStruct((1, bp), jnp.float32),
        grid=(bp // tb_eff,),
        in_specs=[
            pl.BlockSpec((3, tb_eff), lambda i: (0, i), memory_space=pltpu.VMEM),
            const(w1b), const(b1c), const(w2b), const(b2c),
            const(w3c), const(b3c),
        ],
        out_specs=pl.BlockSpec((1, tb_eff), lambda i: (0, i),
                               memory_space=pltpu.VMEM),
        compiler_params=pltpu.CompilerParams(
            dimension_semantics=("parallel",),
            vmem_limit_bytes=32 * 1024 * 1024,
        ),
        cost_estimate=cost,
    )(xt, w1b, b1c, w2b, b2c, w3c, b3c)

    return out_t[:, :B].T                                             # [B, 1] f32


def init_params(key):
    """PyTorch-style U(-1/sqrt(fan_in), 1/sqrt(fan_in)) init, (out, in) weights."""
    def linear(k, fan_in, fan_out):
        kw, kb = jax.random.split(k)
        bound = 1.0 / jnp.sqrt(fan_in)
        w = jax.random.uniform(kw, (fan_out, fan_in), jnp.float32, -bound, bound)
        b = jax.random.uniform(kb, (fan_out,), jnp.float32, -bound, bound)
        return w, b

    k1, k2, k3 = jax.random.split(key, 3)
    w1, b1 = linear(k1, 3, 128)
    w2, b2 = linear(k2, 128, 64)
    w3, b3 = linear(k3, 64, 1)
    return (w1, b1, w2, b2, w3, b3)


def munet_reference(x, params):
    """Pure-JAX f32 reference for correctness check."""
    w1, b1, w2, b2, w3, b3 = params
    h1 = jnp.maximum(x @ w1.T + b1, 0.0)
    h2 = jnp.maximum(h1 @ w2.T + b2, 0.0)
    return jnp.tanh(h2 @ w3.T + b3) * 2.0


if __name__ == "__main__":
    key = jax.random.PRNGKey(0)
    kx1, kx2, kp = jax.random.split(key, 3)
    params = init_params(kp)

    # Small smoke test (B=8): single grid step, padded lane tile of 128.
    x_small = jax.random.normal(kx1, (8, 3), jnp.float32)
    out_small = jax.block_until_ready(munet_forward(x_small, params))
    ref_small = munet_reference(x_small, params)
    assert out_small.shape == (8, 1)
    assert jnp.allclose(out_small, ref_small, atol=2e-2, rtol=2e-2), \
        "mismatch vs reference (B=8)"

    # Ragged batch exercising the multi-step grid + padding path (3 grid steps).
    x_big = jax.random.normal(kx2, (300, 3), jnp.float32)
    out_big = jax.block_until_ready(munet_forward(x_big, params, tb=128))
    ref_big = munet_reference(x_big, params)
    assert out_big.shape == (300, 1)
    assert jnp.allclose(out_big, ref_big, atol=2e-2, rtol=2e-2), \
        "mismatch vs reference (B=300)"

    print("KERNEL_OK")
</pallas_src>

<mosaic_0001>
module attributes {stable_mosaic.version = 11 : i64} {
  func.func @munet_kernel(%arg0: i32, %arg1: memref<3x128xbf16, #tpu.memory_space<vmem>>, %arg2: memref<128x3xbf16, #tpu.memory_space<vmem>>, %arg3: memref<128x1xf32, #tpu.memory_space<vmem>>, %arg4: memref<64x128xbf16, #tpu.memory_space<vmem>>, %arg5: memref<64x1xf32, #tpu.memory_space<vmem>>, %arg6: memref<64x1xf32, #tpu.memory_space<vmem>>, %arg7: memref<1x1xf32, #tpu.memory_space<vmem>>, %arg8: memref<1x128xf32, #tpu.memory_space<vmem>>) attributes {dimension_semantics = [#tpu.dimension_semantics<parallel>], iteration_bounds = array<i64: 1>, scalar_prefetch = 0 : i64, scratch_operands = 0 : i64, tpu.core_type = #tpu.core_type<tc>, window_params = [{transform_indices = @transform_0, window_bounds = array<i64: 3, 128>}, {pipeline_mode = #tpu.pipeline_mode<synchronous>, transform_indices = @transform_1, window_bounds = array<i64: 128, 3>}, {pipeline_mode = #tpu.pipeline_mode<synchronous>, transform_indices = @transform_2, window_bounds = array<i64: 128, 1>}, {pipeline_mode = #tpu.pipeline_mode<synchronous>, transform_indices = @transform_3, window_bounds = array<i64: 64, 128>}, {pipeline_mode = #tpu.pipeline_mode<synchronous>, transform_indices = @transform_4, window_bounds = array<i64: 64, 1>}, {pipeline_mode = #tpu.pipeline_mode<synchronous>, transform_indices = @transform_5, window_bounds = array<i64: 64, 1>}, {pipeline_mode = #tpu.pipeline_mode<synchronous>, transform_indices = @transform_6, window_bounds = array<i64: 1, 1>}, {transform_indices = @transform_7, window_bounds = array<i64: 1, 128>}]} {
    %c0 = arith.constant 0 : index
    %c0_0 = arith.constant 0 : index
    %0 = vector.load %arg1[%c0, %c0_0] : memref<3x128xbf16, #tpu.memory_space<vmem>>, vector<3x128xbf16>
    %c0_1 = arith.constant 0 : index
    %c0_2 = arith.constant 0 : index
    %1 = vector.load %arg2[%c0_1, %c0_2] : memref<128x3xbf16, #tpu.memory_space<vmem>>, vector<128x3xbf16>
    %cst = arith.constant dense<0.000000e+00> : vector<128x128xf32>
    %2 = tpu.matmul %1, %0, %cst {dimension_numbers = #tpu.dot_dimension_numbers<[1], [0], [0], [1], [0, 0, 1, 1], [], []>} : vector<128x3xbf16>, vector<3x128xbf16>, vector<128x128xf32> -> vector<128x128xf32>
    %c0_3 = arith.constant 0 : index
    %c0_4 = arith.constant 0 : index
    %3 = vector.load %arg3[%c0_3, %c0_4] : memref<128x1xf32, #tpu.memory_space<vmem>>, vector<128x1xf32>
    %4 = vector.broadcast %3 : vector<128x1xf32> to vector<128x128xf32>
    %5 = arith.addf %2, %4 : vector<128x128xf32>
    %cst_5 = arith.constant 0.000000e+00 : f32
    %6 = vector.broadcast %cst_5 : f32 to vector<128x128xf32>
    %7 = arith.maximumf %5, %6 : vector<128x128xf32>
    %c0_6 = arith.constant 0 : index
    %c0_7 = arith.constant 0 : index
    %8 = vector.load %arg4[%c0_6, %c0_7] : memref<64x128xbf16, #tpu.memory_space<vmem>>, vector<64x128xbf16>
    %9 = arith.truncf %7 : vector<128x128xf32> to vector<128x128xbf16>
    %cst_8 = arith.constant dense<0.000000e+00> : vector<64x128xf32>
    %10 = tpu.matmul %8, %9, %cst_8 {dimension_numbers = #tpu.dot_dimension_numbers<[1], [0], [0], [1], [0, 0, 1, 1], [], []>} : vector<64x128xbf16>, vector<128x128xbf16>, vector<64x128xf32> -> vector<64x128xf32>
    %c0_9 = arith.constant 0 : index
    %c0_10 = arith.constant 0 : index
    %11 = vector.load %arg5[%c0_9, %c0_10] : memref<64x1xf32, #tpu.memory_space<vmem>>, vector<64x1xf32>
    %12 = vector.broadcast %11 : vector<64x1xf32> to vector<64x128xf32>
    %13 = arith.addf %10, %12 : vector<64x128xf32>
    %cst_11 = arith.constant 0.000000e+00 : f32
    %14 = vector.broadcast %cst_11 : f32 to vector<64x128xf32>
    %15 = arith.maximumf %13, %14 : vector<64x128xf32>
    %c0_12 = arith.constant 0 : index
    %c0_13 = arith.constant 0 : index
    %16 = vector.load %arg6[%c0_12, %c0_13] : memref<64x1xf32, #tpu.memory_space<vmem>>, vector<64x1xf32>
    %17 = vector.broadcast %16 : vector<64x1xf32> to vector<64x128xf32>
    %18 = arith.mulf %15, %17 : vector<64x128xf32>
    %cst_14 = arith.constant dense<0.000000e+00> : vector<128xf32>
    %19 = vector.multi_reduction <add>, %18, %cst_14 [0] : vector<64x128xf32> to vector<128xf32>
    %20 = vector.shape_cast %19 : vector<128xf32> to vector<1x128xf32>
    %c0_15 = arith.constant 0 : index
    %c0_16 = arith.constant 0 : index
    %21 = vector.load %arg7[%c0_15, %c0_16] : memref<1x1xf32, #tpu.memory_space<vmem>>, vector<1x1xf32>
    %22 = vector.broadcast %21 : vector<1x1xf32> to vector<1x128xf32>
    %23 = arith.addf %20, %22 : vector<1x128xf32>
    %24 = math.tanh %23 : vector<1x128xf32>
    %cst_17 = arith.constant 2.000000e+00 : f32
    %25 = vector.broadcast %cst_17 : f32 to vector<1x128xf32>
    %26 = arith.mulf %24, %25 : vector<1x128xf32>
    %c0_18 = arith.constant 0 : index
    %c0_19 = arith.constant 0 : index
    %27 = vector.load %arg8[%c0_18, %c0_19] : memref<1x128xf32, #tpu.memory_space<vmem>>, vector<1x128xf32>
    tpu.vector_store %arg8[%c0_18, %c0_19], %26 {strides = array<i32>} : memref<1x128xf32, #tpu.memory_space<vmem>>, vector<1x128xf32>,
    return
  }
  func.func @transform_0(%arg0: i32) -> (i32, i32) {
    %c0_i32 = arith.constant 0 : i32
    %c0_i32_0 = arith.constant 0 : i32
    return %c0_i32, %arg0 : i32, i32
  }
  func.func @transform_1(%arg0: i32) -> (i32, i32) {
    %c0_i32 = arith.constant 0 : i32
    %c0_i32_0 = arith.constant 0 : i32
    %c0_i32_1 = arith.constant 0 : i32
    return %c0_i32, %c0_i32_0 : i32, i32
  }
  func.func @transform_2(%arg0: i32) -> (i32, i32) {
    %c0_i32 = arith.constant 0 : i32
    %c0_i32_0 = arith.constant 0 : i32
    %c0_i32_1 = arith.constant 0 : i32
    return %c0_i32, %c0_i32_0 : i32, i32
  }
  func.func @transform_3(%arg0: i32) -> (i32, i32) {
    %c0_i32 = arith.constant 0 : i32
    %c0_i32_0 = arith.constant 0 : i32
    %c0_i32_1 = arith.constant 0 : i32
    return %c0_i32, %c0_i32_0 : i32, i32
  }
  func.func @transform_4(%arg0: i32) -> (i32, i32) {
    %c0_i32 = arith.constant 0 : i32
    %c0_i32_0 = arith.constant 0 : i32
    %c0_i32_1 = arith.constant 0 : i32
    return %c0_i32, %c0_i32_0 : i32, i32
  }
  func.func @transform_5(%arg0: i32) -> (i32, i32) {
    %c0_i32 = arith.constant 0 : i32
    %c0_i32_0 = arith.constant 0 : i32
    %c0_i32_1 = arith.constant 0 : i32
    return %c0_i32, %c0_i32_0 : i32, i32
  }
  func.func @transform_6(%arg0: i32) -> (i32, i32) {
    %c0_i32 = arith.constant 0 : i32
    %c0_i32_0 = arith.constant 0 : i32
    %c0_i32_1 = arith.constant 0 : i32
    return %c0_i32, %c0_i32_0 : i32, i32
  }
  func.func @transform_7(%arg0: i32) -> (i32, i32) {
    %c0_i32 = arith.constant 0 : i32
    %c0_i32_0 = arith.constant 0 : i32
    return %c0_i32, %arg0 : i32, i32
  }
}

</mosaic_0001>

<bundles_post_ra>
// kernel: munet_forward.1
= control target key start
LH: loop header
LB: loop body
LE: loop exit
PB: predicated region body
PF: predicated region fallthrough
CT: control target
= control target key end

     0   :  { %vm207_vm0 = vcmask 1040384   ;;  %vm208_vm1 = vcmask 1041408   ;;  %vm182_vm2 = vcmask 23552   ;;  %v692_v1 = vmov 65535   ;;  %s883_s0 = inlined_call_operand.vmem [shape: bf16[3,128], index: 0, kind: input, shape index: {}]   ;;  %s884_s1 = inlined_call_operand.vmem [shape: bf16[128,3], index: 1, kind: input, shape index: {}]   ;;  %s885_s6 = inlined_call_operand.<no memory space> [shape: f32[1,1], index: 6, kind: input, shape index: {}]   ;;  %s886_s2 = inlined_call_operand.vmem [shape: f32[128,1], index: 2, kind: input, shape index: {}]   ;;  %s887_s4 = inlined_call_operand.vmem [shape: f32[64,1], index: 4, kind: input, shape index: {}]   ;;  %s888_s5 = inlined_call_operand.vmem [shape: f32[64,1], index: 5, kind: input, shape index: {}]   ;;  %s889_s3 = inlined_call_operand.vmem [shape: bf16[64,128], index: 3, kind: input, shape index: {}]   ;;  %s890_s7 = inlined_call_operand.vmem [shape: f32[1,128], index: 7, kind: output, shape index: {}]  }
   0x1   :  { %v29_v0 = vld [vmem:[%s883_s0] sm:$0x3]  ;;  %v209_v2 = vsel %vm207_vm0, 4294967295, %v692_v1  ;;  %v12_v4 = vstv %s885_s6  ;;  %v679_v7 = vld [vmem:[%s884_s1 + $0x8] sm:$0xff]   ;;  %v693_v8 = vmov 0   ;;  %v680_v9 = vld [vmem:[%s884_s1 + $0x10] sm:$0xff]  }
   0x2   :  { %v678_v3 = vld [vmem:[%s884_s1] sm:$0xff]   ;;  %v210_v5 = vsel %vm208_vm1, %v209_v2, 0  ;;  %13 = vst [vmem:[#allocation2] sm:$0x1] %v12_v4  ;;  %676 = vset.pattern.permute.xlu0 %v693_v8  ;;  %677 = vset.pattern.permute.xlu1 %v693_v8  ;;  %v47_v11 = vld [vmem:[%s886_s2 + $0x8] sm:$0xff]  ;;  %v48_v12 = vld [vmem:[%s886_s2 + $0x10] sm:$0xff] }
   0x3   :  { %v212_v6 = vand.u32 %v210_v5, %v29_v0  ;;  %618 = vmatprep.mubr.msk.bf16.mxu0 %vm182_vm2, %v678_v3  ;;  %v46_v10 = vld [vmem:[%s886_s2] sm:$0xff]  ;;  %74 = vperm.xlu1 %677, %v48_v12   ;;  %v49_v13 = vld [vmem:[%s886_s2 + $0x18] sm:$0xff]  ;;  %v51_v17 = vld [vmem:[%s886_s2 + $0x28] sm:$0xff] }
   0x4   :  { %64 = vperm.xlu0 %676, %v46_v10   ;;  %v681_v14 = vld [vmem:[%s884_s1 + $0x18] sm:$0xff]   ;;  %v50_v15 = vld [vmem:[%s886_s2 + $0x20] sm:$0xff]  ;;  %v52_v18 = vld [vmem:[%s886_s2 + $0x30] sm:$0xff] }
   0x5   :  { %616 = vmatprep.subr.bf16.mxu0 %v212_v6  ;;  %v682_v16 = vld [vmem:[%s884_s1 + $0x20] sm:$0xff]   ;;  %v53_v19 = vld [vmem:[%s886_s2 + $0x38] sm:$0xff]  ;;  %v683_v20 = vld [vmem:[%s884_s1 + $0x28] sm:$0xff]  }
   0x6   :  { %617 = vmatpush3.bf16.msra.mxu0 %v212_v6  ;;  %v54_v21 = vld [vmem:[%s886_s2 + $0x40] sm:$0xff]  ;;  %v684_v22 = vld [vmem:[%s884_s1 + $0x30] sm:$0xff]   ;;  %v55_v23 = vld [vmem:[%s886_s2 + $0x48] sm:$0xff] }
   0x7   :  { %79 = vperm.xlu1 %677, %v49_v13   ;;  %v56_v24 = vld [vmem:[%s886_s2 + $0x50] sm:$0xff]  ;;  %v57_v25 = vld [vmem:[%s886_s2 + $0x58] sm:$0xff]  ;;  %v58_v27 = vld [vmem:[%s886_s2 + $0x60] sm:$0xff] }
   0x8   :  { %69 = vperm.xlu0 %676, %v47_v11   ;;  %v685_v26 = vld [vmem:[%s884_s1 + $0x38] sm:$0xff]   ;;  %v59_v28 = vld [vmem:[%s886_s2 + $0x68] sm:$0xff]  ;;  %v60_v29 = vld [vmem:[%s886_s2 + $0x70] sm:$0xff] }
   0x9   :  { %619 = vmatmul.mubr.msk.bf16.vlgmr.msra.gmra.mrb[0].mxu0 %vm182_vm2, %v679_v7  ;;  %v61_v30 = vld [vmem:[%s886_s2 + $0x78] sm:$0xff]  ;;  %v343_v31 = vld [vmem:[%s887_s4] sm:$0xff]  ;;  %v344_v32 = vld [vmem:[%s887_s4 + $0x8] sm:$0xff] }
   0xa   :  { %622 = vmatprep.mubr.msk.bf16.mxu0 %vm182_vm2, %v680_v9  ;;  %v345_v33 = vld [vmem:[%s887_s4 + $0x10] sm:$0xff]  ;;  %v346_v34 = vld [vmem:[%s887_s4 + $0x18] sm:$0xff]  ;;  %v488_v35 = vld [vmem:[%s888_s5] sm:$0xff] }
   0xb   :  { %89 = vperm.xlu1 %677, %v51_v17   ;;  %v489_v36 = vld [vmem:[%s888_s5 + $0x8] sm:$0xff]  ;;  %v347_v37 = vld [vmem:[%s887_s4 + $0x20] sm:$0xff]  ;;  %v490_v38 = vld [vmem:[%s888_s5 + $0x10] sm:$0xff] }
   0xc   :  { %84 = vperm.xlu0 %676, %v50_v15   ;;  %v348_v39 = vld [vmem:[%s887_s4 + $0x28] sm:$0xff]  ;;  %v491_v40 = vld [vmem:[%s888_s5 + $0x18] sm:$0xff]  ;;  %v349_v41 = vld [vmem:[%s887_s4 + $0x30] sm:$0xff] }
   0xd   :  { %v492_v42 = vld [vmem:[%s888_s5 + $0x20] sm:$0xff]  ;;  %v350_v43 = vld [vmem:[%s887_s4 + $0x38] sm:$0xff]  ;;  %v493_v44 = vld [vmem:[%s888_s5 + $0x28] sm:$0xff] }
   0xe   :  { %v494_v45 = vld [vmem:[%s888_s5 + $0x30] sm:$0xff]  ;;  %v495_v46 = vld [vmem:[%s888_s5 + $0x38] sm:$0xff]  ;;  %v557_v47 = vld [vmem:[#allocation2] sm:$0x1] }
   0xf   :  { %99 = vperm.xlu1 %677, %v53_v19   ;;  %v686_v48 = vld [vmem:[%s889_s3] sm:$0xff]   ;;  %v687_v49 = vld [vmem:[%s889_s3 + $0x10] sm:$0xff]  }
  0x10   :  { %94 = vperm.xlu0 %676, %v52_v18   ;;  %654 = vmatprep.mubr.bf16.mxu1 %v687_v49 }
  0x11   :  { %623 = vmatmul.mubr.msk.bf16.gmra.mrb[4].mxu0 %vm182_vm2, %v681_v14 }
  0x12   :  { %626 = vmatprep.mubr.msk.bf16.mxu0 %vm182_vm2, %v682_v16 }
  0x13   :  { %109 = vperm.xlu1 %677, %v55_v23  }
  0x14   :  { %104 = vperm.xlu0 %676, %v54_v21  }
  0x17   :  { %119 = vperm.xlu1 %677, %v57_v25  }
  0x18   :  { %114 = vperm.xlu0 %676, %v56_v24  }
  0x19   :  { %627 = vmatmul.mubr.msk.bf16.gmra.mrb[8].mxu0 %vm182_vm2, %v683_v20 }
  0x1a   :  { %630 = vmatprep.mubr.msk.bf16.mxu0 %vm182_vm2, %v684_v22 }
  0x1b   :  { %129 = vperm.xlu1 %677, %v59_v28  }
  0x1c   :  { %124 = vperm.xlu0 %676, %v58_v27  }
  0x1f   :  { %139 = vperm.xlu1 %677, %v61_v30  }
  0x20   :  { %134 = vperm.xlu0 %676, %v60_v29  }
  0x21   :  { %631 = vmatmul.mubr.msk.bf16.gmra.mrb[12].mxu0 %vm182_vm2, %v685_v26 }
  0x22   :  { %650 = vmatprep.mubr.bf16.mxu0 %v686_v48 }
  0x23   :  { %358 = vperm.xlu1 %677, %v344_v32  }
  0x24   :  { %353 = vperm.xlu0 %676, %v343_v31  }
  0x27   :  { %368 = vperm.xlu1 %677, %v346_v34  }
  0x28   :  { %363 = vperm.xlu0 %676, %v345_v33  }
  0x2b   :  { %503 = vperm.xlu1 %677, %v489_v36  }
  0x2c   :  { %498 = vperm.xlu0 %676, %v488_v35  }
  0x2f   :  { %508 = vperm.xlu1 %677, %v490_v38  }
  0x30   :  { %373 = vperm.xlu0 %676, %v347_v37  }
  0x33   :  { %513 = vperm.xlu1 %677, %v491_v40  }
  0x34   :  { %378 = vperm.xlu0 %676, %v348_v39  }
  0x37   :  { %518 = vperm.xlu1 %677, %v492_v42  }
  0x38   :  { %383 = vperm.xlu0 %676, %v349_v41  }
  0x3b   :  { %523 = vperm.xlu1 %677, %v493_v44  }
  0x3c   :  { %388 = vperm.xlu0 %676, %v350_v43  }
  0x3f   :  { %533 = vperm.xlu1 %677, %v495_v46  }
  0x40   :  { %528 = vperm.xlu0 %676, %v494_v45  }
  0x44   :  { %560 = vperm.xlu0 %676, %v557_v47  }
  0x82   :  { %v75_v51 = vpop.permute.xlu1 %74 }
  0x83   :  { %v65_v50 = vpop.permute.xlu0 %64 }
  0x86   :  { %v80_v53 = vpop.permute.xlu1 %79 }
  0x87   :  { %v70_v52 = vpop.permute.xlu0 %69 }
  0x8a   :  { %v90_v55 = vpop.permute.xlu1 %89 }
  0x8b   :  { %v85_v54 = vpop.permute.xlu0 %84 }
  0x8e   :  { %v100_v60 = vpop.permute.xlu1 %99 }
  0x8f   :  { %v95_v56 = vpop.permute.xlu0 %94 }
  0x92   :  { %v110_v8 = vpop.permute.xlu1 %109 }
  0x93   :  { %v105_v4 = vpop.permute.xlu0 %104 }
  0x96   :  { %v120_v21 = vpop.permute.xlu1 %119 }
  0x97   :  { %v115_v17 = vpop.permute.xlu0 %114 }
  0x9a   :  { %v130_v34 = vpop.permute.xlu1 %129 }
  0x9b   :  { %v125_v29 = vpop.permute.xlu0 %124 }
  0x9e   :  { %v140_v46 = vpop.permute.xlu1 %139 }
  0x9f   :  { %v135_v41 = vpop.permute.xlu0 %134 }
  0xdc   :  { %v620_v57 = vpop.f32.mrb[0].mxu0 }
  0xdd   :  { %v257_v58 = vadd.f32 %v620_v57, %v75_v51  ;;  %v248_v59 = vpop.f32.mrb[1].mxu0 }
  0xde   :  { %v249_v61 = vadd.f32 %v248_v59, %v65_v50  ;;  %v621_v62 = vpop.f32.mrb[2].mxu0  ;;  %v689_v59 = vld [vmem:[%s889_s3 + $0x18] sm:$0xff]  }
  0xdf   :  { %v260_v63 = vadd.f32 %v621_v62, %v80_v53  ;;  %v251_v0 = vpop.f32.mrb[3].mxu0  ;;  %v313_v2 = vmax.f32 %v257_v58, 0.0  ;;  %v688_v58 = vld [vmem:[%s889_s3 + $0x8] sm:$0xff]  }
  0xe0   :  { %v252_v1 = vadd.f32 %v251_v0, %v70_v52  ;;  %v311_v5 = vmax.f32 %v249_v61, 0.0  ;;  %v359_v61 = vpop.permute.xlu1 %358 }
  0xe1   :  { %v314_v3 = vmax.f32 %v260_v63, 0.0 }
  0xe2   :  { %v312_v6 = vmax.f32 %v252_v1, 0.0 }
  0xe3   :  { %v336_v7 = vpack.c.bf16 %v314_v3, %v313_v2 }
  0xe4   :  { %v335_v9 = vpack.c.bf16 %v312_v6, %v311_v5  ;;  %v624_v10 = vpop.f32.mrb[4].mxu0  ;;  %v369_v63 = vpop.permute.xlu1 %368 }
  0xe5   :  { %v273_v11 = vadd.f32 %v624_v10, %v95_v56  ;;  %v264_v12 = vpop.f32.mrb[5].mxu0 }
  0xe6   :  { %v265_v13 = vadd.f32 %v264_v12, %v85_v54  ;;  %v625_v14 = vpop.f32.mrb[6].mxu0  ;;  %634 = vmatprep.subr.bf16.mxu0 %v335_v9  ;;  %658 = vmatprep.subr.bf16.mxu1 %v335_v9 }
  0xe7   :  { %v276_v15 = vadd.f32 %v625_v14, %v100_v60  ;;  %v267_v16 = vpop.f32.mrb[7].mxu0  ;;  %635 = vmatpush3.bf16.msra.mxu0 %v335_v9  ;;  %666 = vmatpush3.bf16.msra.mxu1 %v335_v9  ;;  %v317_v19 = vmax.f32 %v273_v11, 0.0  ;;  %v354_v60 = vpop.permute.xlu0 %353 }
  0xe8   :  { %v268_v18 = vadd.f32 %v267_v16, %v90_v55  ;;  %636 = vmatprep.subr.bf16.mxu0 %v336_v7  ;;  %659 = vmatprep.subr.bf16.mxu1 %v336_v7  ;;  %v315_v22 = vmax.f32 %v265_v13, 0.0  ;;  %v504_v1 = vpop.permute.xlu1 %503 }
  0xe9   :  { %v318_v20 = vmax.f32 %v276_v15, 0.0 }
  0xea   :  { %v316_v23 = vmax.f32 %v268_v18, 0.0 }
  0xeb   :  { %v338_v24 = vpack.c.bf16 %v318_v20, %v317_v19  ;;  %637 = vmatpush3.bf16.msra.mxu0 %v336_v7  ;;  %667 = vmatpush3.bf16.msra.mxu1 %v336_v7  ;;  %v364_v62 = vpop.permute.xlu0 %363 }
  0xec   :  { %v337_v25 = vpack.c.bf16 %v316_v23, %v315_v22  ;;  %v628_v26 = vpop.f32.mrb[8].mxu0  ;;  %v509_v3 = vpop.permute.xlu1 %508 }
  0xed   :  { %v289_v27 = vadd.f32 %v628_v26, %v115_v17  ;;  %v280_v28 = vpop.f32.mrb[9].mxu0 }
  0xee   :  { %v281_v30 = vadd.f32 %v280_v28, %v105_v4  ;;  %v629_v31 = vpop.f32.mrb[10].mxu0  ;;  %638 = vmatprep.subr.bf16.mxu0 %v337_v25  ;;  %660 = vmatprep.subr.bf16.mxu1 %v337_v25 }
  0xef   :  { %v292_v32 = vadd.f32 %v629_v31, %v120_v21  ;;  %v283_v33 = vpop.f32.mrb[11].mxu0  ;;  %639 = vmatpush3.bf16.msra.mxu0 %v337_v25  ;;  %668 = vmatpush3.bf16.msra.mxu1 %v337_v25  ;;  %v321_v36 = vmax.f32 %v289_v27, 0.0  ;;  %v499_v0 = vpop.permute.xlu0 %498 }
  0xf0   :  { %v284_v35 = vadd.f32 %v283_v33, %v110_v8  ;;  %640 = vmatprep.subr.bf16.mxu0 %v338_v24  ;;  %661 = vmatprep.subr.bf16.mxu1 %v338_v24  ;;  %v319_v38 = vmax.f32 %v281_v30, 0.0  ;;  %v514_v5 = vpop.permute.xlu1 %513 }
  0xf1   :  { %v322_v37 = vmax.f32 %v292_v32, 0.0 }
  0xf2   :  { %v320_v39 = vmax.f32 %v284_v35, 0.0 }
  0xf3   :  { %v340_v40 = vpack.c.bf16 %v322_v37, %v321_v36  ;;  %641 = vmatpush3.bf16.msra.mxu0 %v338_v24  ;;  %669 = vmatpush3.bf16.msra.mxu1 %v338_v24  ;;  %v374_v2 = vpop.permute.xlu0 %373 }
  0xf4   :  { %v339_v42 = vpack.c.bf16 %v320_v39, %v319_v38  ;;  %v632_v43 = vpop.f32.mrb[12].mxu0  ;;  %v519_v23 = vpop.permute.xlu1 %518 }
  0xf5   :  { %v305_v44 = vadd.f32 %v632_v43, %v135_v41  ;;  %v296_v45 = vpop.f32.mrb[13].mxu0 }
  0xf6   :  { %v297_v47 = vadd.f32 %v296_v45, %v125_v29  ;;  %v633_v48 = vpop.f32.mrb[14].mxu0  ;;  %642 = vmatprep.subr.bf16.mxu0 %v339_v42  ;;  %662 = vmatprep.subr.bf16.mxu1 %v339_v42 }
  0xf7   :  { %v308_v49 = vadd.f32 %v633_v48, %v140_v46  ;;  %v299_v50 = vpop.f32.mrb[15].mxu0  ;;  %643 = vmatpush3.bf16.msra.mxu0 %v339_v42  ;;  %670 = vmatpush3.bf16.msra.mxu1 %v339_v42  ;;  %v325_v52 = vmax.f32 %v305_v44, 0.0  ;;  %v379_v4 = vpop.permute.xlu0 %378 }
  0xf8   :  { %v300_v51 = vadd.f32 %v299_v50, %v130_v34  ;;  %644 = vmatprep.subr.bf16.mxu0 %v340_v40  ;;  %663 = vmatprep.subr.bf16.mxu1 %v340_v40  ;;  %v323_v54 = vmax.f32 %v297_v47, 0.0  ;;  %v524_v37 = vpop.permute.xlu1 %523  ;;  %v563_v50 = vlaneseq }
  0xf9   :  { %v326_v53 = vmax.f32 %v308_v49, 0.0 }
  0xfa   :  { %v324_v55 = vmax.f32 %v300_v51, 0.0 }
  0xfb   :  { %v342_v56 = vpack.c.bf16 %v326_v53, %v325_v52  ;;  %645 = vmatpush3.bf16.msra.mxu0 %v340_v40  ;;  %671 = vmatpush3.bf16.msra.mxu1 %v340_v40  ;;  %v384_v19 = vpop.permute.xlu0 %383  ;;  %v564_v53 = vshrl.u32 %v563_v50, 7 }
  0xfc   :  { %v341_v57 = vpack.c.bf16 %v324_v55, %v323_v54  ;;  %v534_v47 = vpop.permute.xlu1 %533 }
  0xfe   :  { %646 = vmatprep.subr.bf16.mxu0 %v341_v57  ;;  %664 = vmatprep.subr.bf16.mxu1 %v341_v57 }
  0xff   :  { %647 = vmatpush3.bf16.msra.mxu0 %v341_v57  ;;  %672 = vmatpush3.bf16.msra.mxu1 %v341_v57  ;;  %v389_v32 = vpop.permute.xlu0 %388 }
 0x100   :  { %648 = vmatprep.subr.bf16.mxu0 %v342_v56  ;;  %665 = vmatprep.subr.bf16.mxu1 %v342_v56 }
 0x103   :  { %649 = vmatpush3.bf16.msra.mxu0 %v342_v56  ;;  %673 = vmatpush3.bf16.msra.mxu1 %v342_v56  ;;  %v529_v44 = vpop.permute.xlu0 %528  ;;  %v565_v56 = vsub.s32 0, %v564_v53 }
 0x106   :  { %651 = vmatmul.mubr.bf16.vlgmr.msra.gmra.mrb[16].mxu0 %v688_v58  ;;  %655 = vmatmul.mubr.bf16.vlgmr.msra.gmra.mrb[0].mxu1 %v689_v59 }
 0x107   :  { %v561_v58 = vpop.permute.xlu0 %560 }
 0x1d9   :  { %v652_v6 = vpop.f32.mrb[16].mxu0  ;;  %v656_v7 = vpop.f32.mrb[0].mxu1 }
 0x1da   :  { %v449_v8 = vpop.f32.mrb[17].mxu0  ;;  %v465_v9 = vpop.f32.mrb[1].mxu1  ;;  %v458_v10 = vadd.f32 %v652_v6, %v364_v62  ;;  %v474_v29 = vadd.f32 %v656_v7, %v384_v19 }
 0x1db   :  { %v450_v11 = vadd.f32 %v449_v8, %v354_v60  ;;  %v653_v12 = vpop.f32.mrb[18].mxu0  ;;  %v657_v13 = vpop.f32.mrb[2].mxu1  ;;  %v466_v21 = vadd.f32 %v465_v9, %v374_v2  ;;  %v566_v60 = vrot.slane %v561_v58, %v565_v56 }
 0x1dc   :  { %v452_v14 = vpop.f32.mrb[19].mxu0  ;;  %v468_v15 = vpop.f32.mrb[3].mxu1  ;;  %v461_v17 = vadd.f32 %v653_v12, %v369_v63  ;;  %v482_v20 = vmax.f32 %v458_v10, 0.0  ;;  %v477_v34 = vadd.f32 %v657_v13, %v389_v32  ;;  %v486_v38 = vmax.f32 %v474_v29, 0.0 }
 0x1dd   :  { %v480_v16 = vmax.f32 %v450_v11, 0.0  ;;  %v453_v18 = vadd.f32 %v452_v14, %v359_v61  ;;  %v469_v27 = vadd.f32 %v468_v15, %v379_v4  ;;  %v484_v30 = vmax.f32 %v466_v21, 0.0 }
 0x1de   :  { %v483_v25 = vmax.f32 %v461_v17, 0.0  ;;  %v538_v28 = vmul.f32 %v509_v3, %v482_v20  ;;  %v487_v41 = vmax.f32 %v477_v34, 0.0  ;;  %v542_v45 = vmul.f32 %v529_v44, %v486_v38 }
 0x1df   :  { %v481_v22 = vmax.f32 %v453_v18, 0.0  ;;  %v536_v24 = vmul.f32 %v499_v0, %v480_v16  ;;  %v485_v36 = vmax.f32 %v469_v27, 0.0  ;;  %v540_v39 = vmul.f32 %v519_v23, %v484_v30 }
 0x1e0   :  { %v539_v33 = vmul.f32 %v514_v5, %v483_v25  ;;  %v543_v48 = vmul.f32 %v534_v47, %v487_v41 }
 0x1e1   :  { %v537_v26 = vmul.f32 %v504_v1, %v481_v22  ;;  %v541_v42 = vmul.f32 %v524_v37, %v485_v36 }
 0x1e3   :  { %v544_v31 = vadd.f32 %v537_v26, %v536_v24 }
 0x1e5   :  { %v545_v35 = vadd.f32 %v544_v31, %v538_v28 }
 0x1e7   :  { %v546_v40 = vadd.f32 %v545_v35, %v539_v33 }
 0x1e9   :  { %v547_v43 = vadd.f32 %v546_v40, %v540_v39 }
 0x1eb   :  { %v548_v46 = vadd.f32 %v547_v43, %v541_v42 }
 0x1ed   :  { %v549_v49 = vadd.f32 %v548_v46, %v542_v45 }
 0x1ef   :  { %v550_v51 = vadd.f32 %v549_v49, %v543_v48 }
 0x1f1   :  { %v551_v52 = vrot.slane %v550_v51, 4 }
 0x1f3   :  { %v552_v54 = vadd.f32 %v551_v52, %v550_v51 }
 0x1f5   :  { %v553_v55 = vrot.slane %v552_v54, 2 }
 0x1f7   :  { %v554_v57 = vadd.f32 %v553_v55, %v552_v54 }
 0x1f9   :  { %v555_v59 = vrot.slane %v554_v57, 1 }
 0x1fb   :  { %v556_v61 = vadd.f32 %v555_v59, %v554_v57 }
 0x1fd   :  { %v567_v62 = vadd.f32 %v566_v60, %v556_v61 }
 0x1ff   :  { %690 = vtanh.f32 %v567_v62 }
 0x209   :  { %v691_v63 = vpop.eup %690 }
 0x20a   :  { %v569_v0 = vmul.f32 2.0, %v691_v63 }
 0x20c   :  { %570 = vst [vmem:[%s890_s7] sm:$0x1] %v569_v0 }

</bundles_post_ra>
